<compile_context>
chip_gen: v6e
topology: v6e:2x2x1
jax: 0.10.0
libtpu: 0.0.40
codegen_flags: <defaults>
</compile_context>

<pallas_src>
import functools

import jax
import jax.numpy as jnp
from jax import lax
from jax.experimental import pallas as pl
from jax.experimental.pallas import tpu as pltpu


def _rollout_kernel(h0_ref, w_ref, b_ref, out_ref, h_scratch, *, unroll):
    """One grid step = one time-chunk of the autonomous rollout.

    h0_ref:    (B, H)       initial hidden state (only read at chunk 0)
    w_ref:     (H, H)       W_hh^T, resident & constant across all chunks
    b_ref:     (1, H)       b_hh
    out_ref:   (Tc, B, H)   this chunk's hidden-state trajectory
    h_scratch: (B, H) f32   hidden state carried across chunks
    """
    c = pl.program_id(0)

    @pl.when(c == 0)
    def _():
        h_scratch[...] = h0_ref[...].astype(jnp.float32)

    # Hoisted: weight load and bias broadcast are loop-invariant.
    w = w_ref[...]
    b = jnp.broadcast_to(b_ref[...], h_scratch.shape)

    chunk = out_ref.shape[0]

    def body(t, h):
        # h_t = tanh(h_{t-1} @ W_hh^T + b_hh)   (W pre-transposed on host)
        h_new = jnp.tanh(
            jnp.dot(h, w, preferred_element_type=jnp.float32) + b)
        out_ref[t] = h_new.astype(out_ref.dtype)  # (B, H) tile, lane-dense
        return h_new

    h_final = lax.fori_loop(0, chunk, body, h_scratch[...], unroll=unroll)
    h_scratch[...] = h_final


def eval_autonomous_simple(h0, w_hh, b_hh, num_steps, *,
                           max_chunk_bytes=4 << 20):
    """Autonomous simple-RNN rollout.

    h0:   [B, H] float32
    w_hh: [H, H] float32 (PyTorch convention: h_new = tanh(W_hh @ h + b_hh))
    b_hh: [H]    float32
    returns [B, num_steps, H] float32 (batch_first=True)
    """
    B, H = h0.shape
    h0 = jnp.asarray(h0, jnp.float32)
    w_t = jnp.asarray(w_hh, jnp.float32).T          # kernel computes h @ W
    b2 = jnp.asarray(b_hh, jnp.float32).reshape(1, H)

    # Time-chunking: keep the (chunk, B, H) f32 output block under a modest
    # VMEM budget (works within v7x's smaller VMEM; trivial for small T).
    step_bytes = B * H * 4
    chunk = int(max(1, min(num_steps, max_chunk_bytes // step_bytes)))
    num_chunks = pl.cdiv(num_steps, chunk)
    t_pad = num_chunks * chunk

    # Fully unroll tiny chunks; modest unroll otherwise (LLO visibility).
    unroll = chunk if chunk <= 8 else 8
    kernel = functools.partial(_rollout_kernel, unroll=unroll)

    grid_spec = pltpu.PrefetchScalarGridSpec(
        num_scalar_prefetch=0,
        grid=(num_chunks,),
        in_specs=[
            pl.BlockSpec((B, H), lambda c: (0, 0)),      # h0 (resident)
            pl.BlockSpec((H, H), lambda c: (0, 0)),      # W_hh^T (resident)
            pl.BlockSpec((1, H), lambda c: (0, 0)),      # b_hh (resident)
        ],
        out_specs=pl.BlockSpec((chunk, B, H), lambda c: (c, 0, 0)),
        scratch_shapes=[pltpu.VMEM((B, H), jnp.float32)],
    )

    out_tbh = pl.pallas_call(
        kernel,
        out_shape=jax.ShapeDtypeStruct((t_pad, B, H), jnp.float32),
        grid_spec=grid_spec,
        compiler_params=pltpu.CompilerParams(
            # Time (chunk) axis is a sequential recurrence -> must stay
            # "arbitrary"; never mark it "parallel".
            dimension_semantics=("arbitrary",)),
    )(h0, w_t, b2)

    # (T_pad, B, H) -> drop chunk padding -> batch_first (B, T, H).
    return jnp.transpose(out_tbh[:num_steps], (1, 0, 2))


def _reference(h0, w_hh, b_hh, num_steps):
    outs = []
    h = jnp.asarray(h0, jnp.float32)
    for _ in range(num_steps):
        h = jnp.tanh(h @ w_hh.T + b_hh)
        outs.append(h)
    return jnp.stack(outs, axis=1)


if __name__ == "__main__":
    B, H, T = 8, 128, 8   # batch, hidden, rollout length (aligned to 8x128 vregs)

    key = jax.random.PRNGKey(0)
    k_h, k_w, k_b = jax.random.split(key, 3)

    h0 = jax.random.normal(k_h, (B, H), dtype=jnp.float32)
    # Small-magnitude recurrent weights keep tanh unsaturated over the rollout.
    w_hh = 0.1 * jax.random.normal(k_w, (H, H), dtype=jnp.float32)
    b_hh = 0.01 * jax.random.normal(k_b, (H,), dtype=jnp.float32)

    out = eval_autonomous_simple(h0, w_hh, b_hh, T)
    out = jax.block_until_ready(out)

    ref = _reference(h0, w_hh, b_hh, T)
    assert out.shape == (B, T, H)
    assert jnp.allclose(out, ref, atol=1e-5, rtol=1e-5)

    print("KERNEL_OK")
</pallas_src>

<mosaic_0001>
module attributes {stable_mosaic.version = 11 : i64} {
  func.func @_rollout_kernel(%arg0: i32, %arg1: memref<8x128xf32, #tpu.memory_space<vmem>>, %arg2: memref<128x128xf32, #tpu.memory_space<vmem>>, %arg3: memref<1x128xf32, #tpu.memory_space<vmem>>, %arg4: memref<8x8x128xf32, #tpu.memory_space<vmem>>, %arg5: memref<8x128xf32, #tpu.memory_space<vmem>>) attributes {dimension_semantics = [#tpu.dimension_semantics<arbitrary>], iteration_bounds = array<i64: 1>, scalar_prefetch = 0 : i64, scratch_operands = 1 : i64, tpu.core_type = #tpu.core_type<tc>, window_params = [{pipeline_mode = #tpu.pipeline_mode<synchronous>, transform_indices = @transform_0, window_bounds = array<i64: 8, 128>}, {pipeline_mode = #tpu.pipeline_mode<synchronous>, transform_indices = @transform_1, window_bounds = array<i64: 128, 128>}, {pipeline_mode = #tpu.pipeline_mode<synchronous>, transform_indices = @transform_2, window_bounds = array<i64: 1, 128>}, {transform_indices = @transform_3, window_bounds = array<i64: 8, 8, 128>}]} {
    %c0_i32 = arith.constant 0 : i32
    %0 = arith.cmpi eq, %arg0, %c0_i32 : i32
    %1 = arith.extui %0 : i1 to i32
    %c0_i32_0 = arith.constant 0 : i32
    %2 = arith.cmpi ne, %1, %c0_i32_0 : i32
    scf.if %2 {
      %c0_32 = arith.constant 0 : index
      %c0_33 = arith.constant 0 : index
      %65 = vector.load %arg1[%c0_32, %c0_33] : memref<8x128xf32, #tpu.memory_space<vmem>>, vector<8x128xf32>
      %c0_34 = arith.constant 0 : index
      %c0_35 = arith.constant 0 : index
      %66 = vector.load %arg5[%c0_34, %c0_35] : memref<8x128xf32, #tpu.memory_space<vmem>>, vector<8x128xf32>
      tpu.vector_store %arg5[%c0_34, %c0_35], %65 {strides = array<i32>} : memref<8x128xf32, #tpu.memory_space<vmem>>, vector<8x128xf32>,
    } else {
    }
    %c0 = arith.constant 0 : index
    %c0_1 = arith.constant 0 : index
    %3 = vector.load %arg2[%c0, %c0_1] : memref<128x128xf32, #tpu.memory_space<vmem>>, vector<128x128xf32>
    %c0_2 = arith.constant 0 : index
    %c0_3 = arith.constant 0 : index
    %4 = vector.load %arg3[%c0_2, %c0_3] : memref<1x128xf32, #tpu.memory_space<vmem>>, vector<1x128xf32>
    %5 = vector.shape_cast %4 : vector<1x128xf32> to vector<1x128xf32>
    %6 = vector.broadcast %5 : vector<1x128xf32> to vector<8x128xf32>
    %c0_4 = arith.constant 0 : index
    %c0_5 = arith.constant 0 : index
    %7 = vector.load %arg5[%c0_4, %c0_5] : memref<8x128xf32, #tpu.memory_space<vmem>>, vector<8x128xf32>
    %c0_i32_6 = arith.constant 0 : i32
    %cst = arith.constant dense<0.000000e+00> : vector<8x128xf32>
    %8 = tpu.matmul %7, %3, %cst {dimension_numbers = #tpu.dot_dimension_numbers<[1], [0], [0], [1], [0, 0, 1, 1], [], []>} : vector<8x128xf32>, vector<128x128xf32>, vector<8x128xf32> -> vector<8x128xf32>
    %9 = arith.addf %8, %6 : vector<8x128xf32>
    %10 = math.tanh %9 : vector<8x128xf32>
    %11 = arith.index_cast %c0_i32_6 : i32 to index
    %c0_7 = arith.constant 0 : index
    %c0_8 = arith.constant 0 : index
    %12 = vector.load %arg4[%11, %c0_7, %c0_8] : memref<8x8x128xf32, #tpu.memory_space<vmem>>, vector<1x8x128xf32>
    %13 = vector.shape_cast %12 : vector<1x8x128xf32> to vector<8x128xf32>
    %14 = vector.shape_cast %10 : vector<8x128xf32> to vector<1x8x128xf32>
    tpu.vector_store %arg4[%11, %c0_7, %c0_8], %14 {strides = array<i32>} : memref<8x8x128xf32, #tpu.memory_space<vmem>>, vector<1x8x128xf32>,
    %c1_i32 = arith.constant 1 : i32
    %cst_9 = arith.constant dense<0.000000e+00> : vector<8x128xf32>
    %15 = tpu.matmul %10, %3, %cst_9 {dimension_numbers = #tpu.dot_dimension_numbers<[1], [0], [0], [1], [0, 0, 1, 1], [], []>} : vector<8x128xf32>, vector<128x128xf32>, vector<8x128xf32> -> vector<8x128xf32>
    %16 = arith.addf %15, %6 : vector<8x128xf32>
    %17 = math.tanh %16 : vector<8x128xf32>
    %18 = arith.index_cast %c1_i32 : i32 to index
    %c0_10 = arith.constant 0 : index
    %c0_11 = arith.constant 0 : index
    %19 = vector.load %arg4[%18, %c0_10, %c0_11] : memref<8x8x128xf32, #tpu.memory_space<vmem>>, vector<1x8x128xf32>
    %20 = vector.shape_cast %19 : vector<1x8x128xf32> to vector<8x128xf32>
    %21 = vector.shape_cast %17 : vector<8x128xf32> to vector<1x8x128xf32>
    tpu.vector_store %arg4[%18, %c0_10, %c0_11], %21 {strides = array<i32>} : memref<8x8x128xf32, #tpu.memory_space<vmem>>, vector<1x8x128xf32>,
    %c2_i32 = arith.constant 2 : i32
    %cst_12 = arith.constant dense<0.000000e+00> : vector<8x128xf32>
    %22 = tpu.matmul %17, %3, %cst_12 {dimension_numbers = #tpu.dot_dimension_numbers<[1], [0], [0], [1], [0, 0, 1, 1], [], []>} : vector<8x128xf32>, vector<128x128xf32>, vector<8x128xf32> -> vector<8x128xf32>
    %23 = arith.addf %22, %6 : vector<8x128xf32>
    %24 = math.tanh %23 : vector<8x128xf32>
    %25 = arith.index_cast %c2_i32 : i32 to index
    %c0_13 = arith.constant 0 : index
    %c0_14 = arith.constant 0 : index
    %26 = vector.load %arg4[%25, %c0_13, %c0_14] : memref<8x8x128xf32, #tpu.memory_space<vmem>>, vector<1x8x128xf32>
    %27 = vector.shape_cast %26 : vector<1x8x128xf32> to vector<8x128xf32>
    %28 = vector.shape_cast %24 : vector<8x128xf32> to vector<1x8x128xf32>
    tpu.vector_store %arg4[%25, %c0_13, %c0_14], %28 {strides = array<i32>} : memref<8x8x128xf32, #tpu.memory_space<vmem>>, vector<1x8x128xf32>,
    %c3_i32 = arith.constant 3 : i32
    %cst_15 = arith.constant dense<0.000000e+00> : vector<8x128xf32>
    %29 = tpu.matmul %24, %3, %cst_15 {dimension_numbers = #tpu.dot_dimension_numbers<[1], [0], [0], [1], [0, 0, 1, 1], [], []>} : vector<8x128xf32>, vector<128x128xf32>, vector<8x128xf32> -> vector<8x128xf32>
    %30 = arith.addf %29, %6 : vector<8x128xf32>
    %31 = math.tanh %30 : vector<8x128xf32>
    %32 = arith.index_cast %c3_i32 : i32 to index
    %c0_16 = arith.constant 0 : index
    %c0_17 = arith.constant 0 : index
    %33 = vector.load %arg4[%32, %c0_16, %c0_17] : memref<8x8x128xf32, #tpu.memory_space<vmem>>, vector<1x8x128xf32>
    %34 = vector.shape_cast %33 : vector<1x8x128xf32> to vector<8x128xf32>
    %35 = vector.shape_cast %31 : vector<8x128xf32> to vector<1x8x128xf32>
    tpu.vector_store %arg4[%32, %c0_16, %c0_17], %35 {strides = array<i32>} : memref<8x8x128xf32, #tpu.memory_space<vmem>>, vector<1x8x128xf32>,
    %c4_i32 = arith.constant 4 : i32
    %cst_18 = arith.constant dense<0.000000e+00> : vector<8x128xf32>
    %36 = tpu.matmul %31, %3, %cst_18 {dimension_numbers = #tpu.dot_dimension_numbers<[1], [0], [0], [1], [0, 0, 1, 1], [], []>} : vector<8x128xf32>, vector<128x128xf32>, vector<8x128xf32> -> vector<8x128xf32>
    %37 = arith.addf %36, %6 : vector<8x128xf32>
    %38 = math.tanh %37 : vector<8x128xf32>
    %39 = arith.index_cast %c4_i32 : i32 to index
    %c0_19 = arith.constant 0 : index
    %c0_20 = arith.constant 0 : index
    %40 = vector.load %arg4[%39, %c0_19, %c0_20] : memref<8x8x128xf32, #tpu.memory_space<vmem>>, vector<1x8x128xf32>
    %41 = vector.shape_cast %40 : vector<1x8x128xf32> to vector<8x128xf32>
    %42 = vector.shape_cast %38 : vector<8x128xf32> to vector<1x8x128xf32>
    tpu.vector_store %arg4[%39, %c0_19, %c0_20], %42 {strides = array<i32>} : memref<8x8x128xf32, #tpu.memory_space<vmem>>, vector<1x8x128xf32>,
    %c5_i32 = arith.constant 5 : i32
    %cst_21 = arith.constant dense<0.000000e+00> : vector<8x128xf32>
    %43 = tpu.matmul %38, %3, %cst_21 {dimension_numbers = #tpu.dot_dimension_numbers<[1], [0], [0], [1], [0, 0, 1, 1], [], []>} : vector<8x128xf32>, vector<128x128xf32>, vector<8x128xf32> -> vector<8x128xf32>
    %44 = arith.addf %43, %6 : vector<8x128xf32>
    %45 = math.tanh %44 : vector<8x128xf32>
    %46 = arith.index_cast %c5_i32 : i32 to index
    %c0_22 = arith.constant 0 : index
    %c0_23 = arith.constant 0 : index
    %47 = vector.load %arg4[%46, %c0_22, %c0_23] : memref<8x8x128xf32, #tpu.memory_space<vmem>>, vector<1x8x128xf32>
    %48 = vector.shape_cast %47 : vector<1x8x128xf32> to vector<8x128xf32>
    %49 = vector.shape_cast %45 : vector<8x128xf32> to vector<1x8x128xf32>
    tpu.vector_store %arg4[%46, %c0_22, %c0_23], %49 {strides = array<i32>} : memref<8x8x128xf32, #tpu.memory_space<vmem>>, vector<1x8x128xf32>,
    %c6_i32 = arith.constant 6 : i32
    %cst_24 = arith.constant dense<0.000000e+00> : vector<8x128xf32>
    %50 = tpu.matmul %45, %3, %cst_24 {dimension_numbers = #tpu.dot_dimension_numbers<[1], [0], [0], [1], [0, 0, 1, 1], [], []>} : vector<8x128xf32>, vector<128x128xf32>, vector<8x128xf32> -> vector<8x128xf32>
    %51 = arith.addf %50, %6 : vector<8x128xf32>
    %52 = math.tanh %51 : vector<8x128xf32>
    %53 = arith.index_cast %c6_i32 : i32 to index
    %c0_25 = arith.constant 0 : index
    %c0_26 = arith.constant 0 : index
    %54 = vector.load %arg4[%53, %c0_25, %c0_26] : memref<8x8x128xf32, #tpu.memory_space<vmem>>, vector<1x8x128xf32>
    %55 = vector.shape_cast %54 : vector<1x8x128xf32> to vector<8x128xf32>
    %56 = vector.shape_cast %52 : vector<8x128xf32> to vector<1x8x128xf32>
    tpu.vector_store %arg4[%53, %c0_25, %c0_26], %56 {strides = array<i32>} : memref<8x8x128xf32, #tpu.memory_space<vmem>>, vector<1x8x128xf32>,
    %c7_i32 = arith.constant 7 : i32
    %cst_27 = arith.constant dense<0.000000e+00> : vector<8x128xf32>
    %57 = tpu.matmul %52, %3, %cst_27 {dimension_numbers = #tpu.dot_dimension_numbers<[1], [0], [0], [1], [0, 0, 1, 1], [], []>} : vector<8x128xf32>, vector<128x128xf32>, vector<8x128xf32> -> vector<8x128xf32>
    %58 = arith.addf %57, %6 : vector<8x128xf32>
    %59 = math.tanh %58 : vector<8x128xf32>
    %60 = arith.index_cast %c7_i32 : i32 to index
    %c0_28 = arith.constant 0 : index
    %c0_29 = arith.constant 0 : index
    %61 = vector.load %arg4[%60, %c0_28, %c0_29] : memref<8x8x128xf32, #tpu.memory_space<vmem>>, vector<1x8x128xf32>
    %62 = vector.shape_cast %61 : vector<1x8x128xf32> to vector<8x128xf32>
    %63 = vector.shape_cast %59 : vector<8x128xf32> to vector<1x8x128xf32>
    tpu.vector_store %arg4[%60, %c0_28, %c0_29], %63 {strides = array<i32>} : memref<8x8x128xf32, #tpu.memory_space<vmem>>, vector<1x8x128xf32>,
    %c8_i32 = arith.constant 8 : i32
    %c0_30 = arith.constant 0 : index
    %c0_31 = arith.constant 0 : index
    %64 = vector.load %arg5[%c0_30, %c0_31] : memref<8x128xf32, #tpu.memory_space<vmem>>, vector<8x128xf32>
    tpu.vector_store %arg5[%c0_30, %c0_31], %59 {strides = array<i32>} : memref<8x128xf32, #tpu.memory_space<vmem>>, vector<8x128xf32>,
    return
  }
  func.func @transform_0(%arg0: i32) -> (i32, i32) {
    %c0_i32 = arith.constant 0 : i32
    %c0_i32_0 = arith.constant 0 : i32
    %c0_i32_1 = arith.constant 0 : i32
    return %c0_i32, %c0_i32_0 : i32, i32
  }
  func.func @transform_1(%arg0: i32) -> (i32, i32) {
    %c0_i32 = arith.constant 0 : i32
    %c0_i32_0 = arith.constant 0 : i32
    %c0_i32_1 = arith.constant 0 : i32
    return %c0_i32, %c0_i32_0 : i32, i32
  }
  func.func @transform_2(%arg0: i32) -> (i32, i32) {
    %c0_i32 = arith.constant 0 : i32
    %c0_i32_0 = arith.constant 0 : i32
    %c0_i32_1 = arith.constant 0 : i32
    return %c0_i32, %c0_i32_0 : i32, i32
  }
  func.func @transform_3(%arg0: i32) -> (i32, i32, i32) {
    %c0_i32 = arith.constant 0 : i32
    %c0_i32_0 = arith.constant 0 : i32
    %c0_i32_1 = arith.constant 0 : i32
    return %arg0, %c0_i32, %c0_i32_0 : i32, i32, i32
  }
}

</mosaic_0001>

<bundles_post_ra>
// kernel: tpu_custom_call.1
= control target key start
LH: loop header
LB: loop body
LE: loop exit
PB: predicated region body
PF: predicated region fallthrough
CT: control target
= control target key end

     0   :  { %8 = vsyncpa [#allocation4], 0  ;;  %s1538_s0 = inlined_call_operand.hbm [shape: f32[8,128], index: 0, kind: input, shape index: {}]   ;;  %s1539_s1 = inlined_call_operand.hbm [shape: f32[128,128], index: 1, kind: input, shape index: {}]   ;;  %s1540_s2 = inlined_call_operand.vmem [shape: f32[1,128], index: 2, kind: input, shape index: {}]   ;;  %s1541_s3 = inlined_call_operand.hbm [shape: f32[8,8,128], index: 3, kind: output, shape index: {}]  }
   0x1   :  { %9 = vsyncpa [#allocation7], 0 }
   0x2   :  { %10 = vsyncpa [#allocation5], 0  ;;  %s1179_s12 = smov [#allocation3]   ;;  %s1180_s14 = smov [#allocation6]  }
   0x3   :  { %s17_s13 = sshll.u32 %s1179_s12, 4  ;;  %s26_s15 = sshll.u32 %s1180_s14, 4  ;;  %s18_s13 = int_to_ptr.vmem [resolvable:$true] %s17_s13  ;;  %s27_s15 = int_to_ptr.vmem [resolvable:$true] %s26_s15 }
   0x4   :  { %s1121_s16 = scalar_lea.vmem %s18_s13, 128  ;;  %p1126_p1 = scmp.lt.s32.totalorder %s18_s13, %s18_s13 }
   0x5   :  { %p1122_p0 = scmp.ne.s32.totalorder %s18_s13, %s1121_s16  ;;  %p1127_p2 = scmp.lt.s32.totalorder %s1121_s16, %s1121_s16 }
   0x7   :  { %p1128_p3 = por %p1127_p2, %p1126_p1 }
   0x9   :  { %p1129_p4 = pnand %p1128_p3, %p1122_p0 }
   0xb   :  { %1132 = shalt.err (!%p1129_p4)
}
   0xc   :  { %20 = dma.hbm_to_vmem [thread:$0]  %s1538_s0, 128, %s18_s13, [#allocation4]  }
   0xd   :  { %s1141_s19 = scalar_lea.vmem %s27_s15, 2048  ;;  %p1146_p6 = scmp.lt.s32.totalorder %s27_s15, %s27_s15 }
   0xe   :  { %p1142_p5 = scmp.ne.s32.totalorder %s27_s15, %s1141_s19  ;;  %p1147_p7 = scmp.lt.s32.totalorder %s1141_s19, %s1141_s19 }
  0x10   :  { %p1148_p8 = por %p1147_p7, %p1146_p6 }
  0x12   :  { %p1149_p9 = pnand %p1148_p8, %p1142_p5 }
  0x14   :  { %1152 = shalt.err (!%p1149_p9)
}
  0x15   :  { %s1181_s20 = smov 128   ;;  %s1182_s21 = smov 8  }
  0x16   :  { %32 = dma.hbm_to_vmem [thread:$0]  %s1539_s1, 2048, %s27_s15, [#allocation7], %s1181_s20, %s1181_s20, %s1182_s21  }
  0x17   :  { %1173 = dma.done.wait [#allocation4], 128  }
  0x18   :  { %1174 = vsyncadd [#allocation4], 4294967168 }
  0x19   :  { %1175 = dma.done.wait [#allocation7], 2048  }
  0x1a   :  { %1176 = vsyncadd [#allocation7], 4294965248  ;;  %v1183_v0 = vmov 0.0   ;;  %vm1184_vm0 = vmmov 0   ;;  %v1221_v1 = vld [vmem:[#allocation6 + $0x78] sm:$0xff]  ;;  %v1223_v2 = vld [vmem:[#allocation6 + $0x70] sm:$0xff] }
  0x1b   :  { %810 = vmatprep.subr.mxu0 %v1183_v0  ;;  %842 = vmatprep.mubr.msk.f32.mxu0 %vm1184_vm0, %v1183_v0  ;;  %v1228_v3 = vld [vmem:[#allocation6 + $0x68] sm:$0xff]  ;;  %v1234_v4 = vld [vmem:[#allocation6 + $0x60] sm:$0xff]  ;;  %v1240_v5 = vld [vmem:[#allocation6 + $0x58] sm:$0xff] }
  0x1c   :  { %845 = vmatprep.subr.mxu1 %v1183_v0  ;;  %877 = vmatprep.mubr.msk.f32.mxu1 %vm1184_vm0, %v1183_v0  ;;  %v1246_v6 = vld [vmem:[#allocation6 + $0x50] sm:$0xff]  ;;  %v1252_v7 = vld [vmem:[#allocation6 + $0x48] sm:$0xff]  ;;  %v1258_v8 = vld [vmem:[#allocation6 + $0x40] sm:$0xff] }
  0x1d   :  { %811 = vmatpush3.msra.mxu0 %v1221_v1  ;;  %846 = vmatpush3.msra.mxu1 %v1221_v1  ;;  %v1264_v9 = vld [vmem:[#allocation6 + $0x38] sm:$0xff]  ;;  %v1270_v10 = vld [vmem:[#allocation6 + $0x30] sm:$0xff]  ;;  %v1276_v11 = vld [vmem:[#allocation6 + $0x28] sm:$0xff] }
  0x1e   :  { %812 = vmatprep.subr.mxu0 %v1183_v0  ;;  %847 = vmatprep.subr.mxu1 %v1183_v0  ;;  %v1282_v12 = vld [vmem:[#allocation6 + $0x20] sm:$0xff]  ;;  %v1288_v13 = vld [vmem:[#allocation6 + $0x18] sm:$0xff]  ;;  %v1294_v14 = vld [vmem:[#allocation6 + $0x10] sm:$0xff] }
  0x1f   :  { %813 = vmatpush3.msra.mxu0 %v1223_v2  ;;  %848 = vmatpush3.msra.mxu1 %v1223_v2  ;;  %v1300_v15 = vld [vmem:[#allocation6 + $0x8] sm:$0xff]  ;;  %v1306_v16 = vld [vmem:[#allocation6] sm:$0xff]  ;;  %v45_v17 = vld [vmem:[#allocation3] sm:$0xff] }
  0x20   :  { %814 = vmatprep.subr.mxu0 %v1183_v0  ;;  %849 = vmatprep.subr.mxu1 %v1183_v0  ;;  %v1354_v18 = vld [vmem:[%s1540_s2] ss:$0 sm:$0xff]  ;;  %s1185_s2 = smov [#allocation8]  }
  0x21   :  { %815 = vmatpush3.msra.mxu0 %v1228_v3  ;;  %850 = vmatpush3.msra.mxu1 %v1228_v3  ;;  %s660_s24 = sshll.u32 %s1185_s2, 4  ;;  %s661_s24 = int_to_ptr.vmem [resolvable:$true] %s660_s24 }
  0x22   :  { %816 = vmatprep.subr.mxu0 %v1183_v0  ;;  %851 = vmatprep.subr.mxu1 %v1183_v0  ;;  %s1153_s25 = scalar_lea.vmem %s661_s24, 1024  ;;  %p1158_p11 = scmp.lt.s32.totalorder %s661_s24, %s661_s24 }
  0x23   :  { %817 = vmatpush3.msra.mxu0 %v1234_v4  ;;  %852 = vmatpush3.msra.mxu1 %v1234_v4  ;;  %p1154_p10 = scmp.ne.s32.totalorder %s661_s24, %s1153_s25  ;;  %p1159_p12 = scmp.lt.s32.totalorder %s1153_s25, %s1153_s25 }
  0x24   :  { %818 = vmatprep.subr.mxu0 %v1183_v0  ;;  %853 = vmatprep.subr.mxu1 %v1183_v0 }
  0x25   :  { %819 = vmatpush3.msra.mxu0 %v1240_v5  ;;  %854 = vmatpush3.msra.mxu1 %v1240_v5  ;;  %p1160_p13 = por %p1159_p12, %p1158_p11 }
  0x26   :  { %820 = vmatprep.subr.mxu0 %v1183_v0  ;;  %855 = vmatprep.subr.mxu1 %v1183_v0 }
  0x27   :  { %821 = vmatpush3.msra.mxu0 %v1246_v6  ;;  %856 = vmatpush3.msra.mxu1 %v1246_v6  ;;  %p1161_p0 = pnand %p1160_p13, %p1154_p10 }
  0x28   :  { %822 = vmatprep.subr.mxu0 %v1183_v0  ;;  %857 = vmatprep.subr.mxu1 %v1183_v0 }
  0x29   :  { %823 = vmatpush3.msra.mxu0 %v1252_v7  ;;  %858 = vmatpush3.msra.mxu1 %v1252_v7 }
  0x2a   :  { %824 = vmatprep.subr.mxu0 %v1183_v0  ;;  %859 = vmatprep.subr.mxu1 %v1183_v0 }
  0x2b   :  { %825 = vmatpush3.msra.mxu0 %v1258_v8  ;;  %860 = vmatpush3.msra.mxu1 %v1258_v8 }
  0x2c   :  { %826 = vmatprep.subr.mxu0 %v1183_v0  ;;  %861 = vmatprep.subr.mxu1 %v1183_v0 }
  0x2d   :  { %827 = vmatpush3.msra.mxu0 %v1264_v9  ;;  %862 = vmatpush3.msra.mxu1 %v1264_v9 }
  0x2e   :  { %828 = vmatprep.subr.mxu0 %v1183_v0  ;;  %863 = vmatprep.subr.mxu1 %v1183_v0 }
  0x2f   :  { %829 = vmatpush3.msra.mxu0 %v1270_v10  ;;  %864 = vmatpush3.msra.mxu1 %v1270_v10 }
  0x30   :  { %830 = vmatprep.subr.mxu0 %v1183_v0  ;;  %865 = vmatprep.subr.mxu1 %v1183_v0 }
  0x31   :  { %831 = vmatpush3.msra.mxu0 %v1276_v11  ;;  %866 = vmatpush3.msra.mxu1 %v1276_v11 }
  0x32   :  { %832 = vmatprep.subr.mxu0 %v1183_v0  ;;  %867 = vmatprep.subr.mxu1 %v1183_v0 }
  0x33   :  { %833 = vmatpush3.msra.mxu0 %v1282_v12  ;;  %868 = vmatpush3.msra.mxu1 %v1282_v12 }
  0x34   :  { %834 = vmatprep.subr.mxu0 %v1183_v0  ;;  %869 = vmatprep.subr.mxu1 %v1183_v0 }
  0x35   :  { %835 = vmatpush3.msra.mxu0 %v1288_v13  ;;  %870 = vmatpush3.msra.mxu1 %v1288_v13 }
  0x36   :  { %836 = vmatprep.subr.mxu0 %v1183_v0  ;;  %871 = vmatprep.subr.mxu1 %v1183_v0 }
  0x37   :  { %837 = vmatpush3.msra.mxu0 %v1294_v14  ;;  %872 = vmatpush3.msra.mxu1 %v1294_v14 }
  0x38   :  { %838 = vmatprep.subr.mxu0 %v1183_v0  ;;  %873 = vmatprep.subr.mxu1 %v1183_v0 }
  0x39   :  { %839 = vmatpush3.msra.mxu0 %v1300_v15  ;;  %874 = vmatpush3.msra.mxu1 %v1300_v15 }
  0x3a   :  { %840 = vmatprep.subr.mxu0 %v1183_v0  ;;  %875 = vmatprep.subr.mxu1 %v1183_v0 }
  0x3b   :  { %841 = vmatpush3.msra.mxu0 %v1306_v16  ;;  %876 = vmatpush3.msra.mxu1 %v1306_v16 }
  0x3c   :  { %843 = vmatmul.mubr.f32.vlgmr.msra.gmra.mxu0 %v45_v17  ;;  %880 = vmatprep.subr.mxu0 %v1183_v0 }
  0x3d   :  { %881 = vmatpush3.msra.mxu0 %v1221_v1  ;;  %912 = vmatprep.mubr.msk.f32.mxu0 %vm1184_vm0, %v1183_v0 }
  0x3e   :  { %882 = vmatprep.subr.mxu0 %v1183_v0  ;;  %915 = vmatprep.subr.mxu1 %v1183_v0 }
  0x3f   :  { %883 = vmatpush3.msra.mxu0 %v1223_v2 }
  0x40   :  { %884 = vmatprep.subr.mxu0 %v1183_v0 }
  0x41   :  { %885 = vmatpush3.msra.mxu0 %v1228_v3 }
  0x42   :  { %886 = vmatprep.subr.mxu0 %v1183_v0 }
  0x43   :  { %887 = vmatpush3.msra.mxu0 %v1234_v4 }
  0x44   :  { %888 = vmatprep.subr.mxu0 %v1183_v0 }
  0x45   :  { %889 = vmatpush3.msra.mxu0 %v1240_v5 }
  0x46   :  { %890 = vmatprep.subr.mxu0 %v1183_v0 }
  0x47   :  { %891 = vmatpush3.msra.mxu0 %v1246_v6 }
  0x48   :  { %892 = vmatprep.subr.mxu0 %v1183_v0 }
  0x49   :  { %893 = vmatpush3.msra.mxu0 %v1252_v7 }
  0x4a   :  { %894 = vmatprep.subr.mxu0 %v1183_v0 }
  0x4b   :  { %895 = vmatpush3.msra.mxu0 %v1258_v8 }
  0x4c   :  { %896 = vmatprep.subr.mxu0 %v1183_v0 }
  0x4d   :  { %897 = vmatpush3.msra.mxu0 %v1264_v9 }
  0x4e   :  { %898 = vmatprep.subr.mxu0 %v1183_v0 }
  0x4f   :  { %899 = vmatpush3.msra.mxu0 %v1270_v10 }
  0x50   :  { %900 = vmatprep.subr.mxu0 %v1183_v0 }
  0x51   :  { %901 = vmatpush3.msra.mxu0 %v1276_v11 }
  0x52   :  { %902 = vmatprep.subr.mxu0 %v1183_v0 }
  0x53   :  { %903 = vmatpush3.msra.mxu0 %v1282_v12 }
  0x54   :  { %904 = vmatprep.subr.mxu0 %v1183_v0 }
  0x55   :  { %905 = vmatpush3.msra.mxu0 %v1288_v13 }
  0x56   :  { %906 = vmatprep.subr.mxu0 %v1183_v0 }
  0x57   :  { %907 = vmatpush3.msra.mxu0 %v1294_v14 }
  0x58   :  { %908 = vmatprep.subr.mxu0 %v1183_v0 }
  0x59   :  { %909 = vmatpush3.msra.mxu0 %v1300_v15 }
  0x5a   :  { %910 = vmatprep.subr.mxu0 %v1183_v0 }
  0x5b   :  { %911 = vmatpush3.msra.mxu0 %v1306_v16 }
  0x5c   :  { %950 = vmatprep.subr.mxu0 %v1183_v0 }
  0xfc   :  { %v137_v19 = vpop.f32.mrf.mxu0 }
  0xfd   :  { %v138_v20 = vadd.f32 %v1354_v18, %v137_v19 }
  0xfe   :  { %v844_v21 = vpop.f32.mrf.mxu0 }
  0xff   :  { %1097 = vtanh.f32 %v138_v20 }
 0x10c   :  { %v1098_v22 = vpop.eup %1097 }
 0x10d   :  { %142 = vst [vmem:[#allocation8] sm:$0xff] %v1098_v22  ;;  %878 = vmatmul.mubr.f32.vlgmr.msra.gmra.mxu1 %v1098_v22 }
 0x10e   :  { %916 = vmatpush3.msra.mxu1 %v1221_v1  ;;  %947 = vmatprep.mubr.msk.f32.mxu1 %vm1184_vm0, %v1183_v0 }
 0x10f   :  { %917 = vmatprep.subr.mxu1 %v1183_v0 }
 0x110   :  { %918 = vmatpush3.msra.mxu1 %v1223_v2 }
 0x111   :  { %919 = vmatprep.subr.mxu1 %v1183_v0 }
 0x112   :  { %920 = vmatpush3.msra.mxu1 %v1228_v3 }
 0x113   :  { %921 = vmatprep.subr.mxu1 %v1183_v0 }
 0x114   :  { %922 = vmatpush3.msra.mxu1 %v1234_v4 }
 0x115   :  { %923 = vmatprep.subr.mxu1 %v1183_v0 }
 0x116   :  { %924 = vmatpush3.msra.mxu1 %v1240_v5 }
 0x117   :  { %925 = vmatprep.subr.mxu1 %v1183_v0 }
 0x118   :  { %926 = vmatpush3.msra.mxu1 %v1246_v6 }
 0x119   :  { %927 = vmatprep.subr.mxu1 %v1183_v0 }
 0x11a   :  { %928 = vmatpush3.msra.mxu1 %v1252_v7 }
 0x11b   :  { %929 = vmatprep.subr.mxu1 %v1183_v0 }
 0x11c   :  { %930 = vmatpush3.msra.mxu1 %v1258_v8 }
 0x11d   :  { %931 = vmatprep.subr.mxu1 %v1183_v0 }
 0x11e   :  { %932 = vmatpush3.msra.mxu1 %v1264_v9 }
 0x11f   :  { %933 = vmatprep.subr.mxu1 %v1183_v0 }
 0x120   :  { %934 = vmatpush3.msra.mxu1 %v1270_v10 }
 0x121   :  { %935 = vmatprep.subr.mxu1 %v1183_v0 }
 0x122   :  { %936 = vmatpush3.msra.mxu1 %v1276_v11 }
 0x123   :  { %937 = vmatprep.subr.mxu1 %v1183_v0 }
 0x124   :  { %938 = vmatpush3.msra.mxu1 %v1282_v12 }
 0x125   :  { %939 = vmatprep.subr.mxu1 %v1183_v0 }
 0x126   :  { %940 = vmatpush3.msra.mxu1 %v1288_v13 }
 0x127   :  { %941 = vmatprep.subr.mxu1 %v1183_v0 }
 0x128   :  { %942 = vmatpush3.msra.mxu1 %v1294_v14 }
 0x129   :  { %943 = vmatprep.subr.mxu1 %v1183_v0 }
 0x12a   :  { %944 = vmatpush3.msra.mxu1 %v1300_v15 }
 0x12b   :  { %945 = vmatprep.subr.mxu1 %v1183_v0 }
 0x12c   :  { %946 = vmatpush3.msra.mxu1 %v1306_v16 }
 0x12d   :  { %985 = vmatprep.subr.mxu1 %v1183_v0 }
 0x1cd   :  { %v209_v23 = vpop.f32.mrf.mxu1 }
 0x1ce   :  { %v210_v24 = vadd.f32 %v1354_v18, %v209_v23 }
 0x1cf   :  { %v879_v25 = vpop.f32.mrf.mxu1 }
 0x1d0   :  { %1099 = vtanh.f32 %v210_v24 }
 0x1dd   :  { %v1100_v26 = vpop.eup %1099 }
 0x1de   :  { %215 = vst [vmem:[#allocation8 + $0x8] sm:$0xff] %v1100_v26  ;;  %913 = vmatmul.mubr.f32.vlgmr.msra.gmra.mxu0 %v1100_v26 }
 0x1df   :  { %951 = vmatpush3.msra.mxu0 %v1221_v1  ;;  %982 = vmatprep.mubr.msk.f32.mxu0 %vm1184_vm0, %v1183_v0 }
 0x1e0   :  { %952 = vmatprep.subr.mxu0 %v1183_v0 }
 0x1e1   :  { %953 = vmatpush3.msra.mxu0 %v1223_v2 }
 0x1e2   :  { %954 = vmatprep.subr.mxu0 %v1183_v0 }
 0x1e3   :  { %955 = vmatpush3.msra.mxu0 %v1228_v3 }
 0x1e4   :  { %956 = vmatprep.subr.mxu0 %v1183_v0 }
 0x1e5   :  { %957 = vmatpush3.msra.mxu0 %v1234_v4 }
 0x1e6   :  { %958 = vmatprep.subr.mxu0 %v1183_v0 }
 0x1e7   :  { %959 = vmatpush3.msra.mxu0 %v1240_v5 }
 0x1e8   :  { %960 = vmatprep.subr.mxu0 %v1183_v0 }
 0x1e9   :  { %961 = vmatpush3.msra.mxu0 %v1246_v6 }
 0x1ea   :  { %962 = vmatprep.subr.mxu0 %v1183_v0 }
 0x1eb   :  { %963 = vmatpush3.msra.mxu0 %v1252_v7 }
 0x1ec   :  { %964 = vmatprep.subr.mxu0 %v1183_v0 }
 0x1ed   :  { %965 = vmatpush3.msra.mxu0 %v1258_v8 }
 0x1ee   :  { %966 = vmatprep.subr.mxu0 %v1183_v0 }
 0x1ef   :  { %967 = vmatpush3.msra.mxu0 %v1264_v9 }
 0x1f0   :  { %968 = vmatprep.subr.mxu0 %v1183_v0 }
 0x1f1   :  { %969 = vmatpush3.msra.mxu0 %v1270_v10 }
 0x1f2   :  { %970 = vmatprep.subr.mxu0 %v1183_v0 }
 0x1f3   :  { %971 = vmatpush3.msra.mxu0 %v1276_v11 }
 0x1f4   :  { %972 = vmatprep.subr.mxu0 %v1183_v0 }
 0x1f5   :  { %973 = vmatpush3.msra.mxu0 %v1282_v12 }
 0x1f6   :  { %974 = vmatprep.subr.mxu0 %v1183_v0 }
 0x1f7   :  { %975 = vmatpush3.msra.mxu0 %v1288_v13 }
 0x1f8   :  { %976 = vmatprep.subr.mxu0 %v1183_v0 }
 0x1f9   :  { %977 = vmatpush3.msra.mxu0 %v1294_v14 }
 0x1fa   :  { %978 = vmatprep.subr.mxu0 %v1183_v0 }
 0x1fb   :  { %979 = vmatpush3.msra.mxu0 %v1300_v15 }
 0x1fc   :  { %980 = vmatprep.subr.mxu0 %v1183_v0 }
 0x1fd   :  { %981 = vmatpush3.msra.mxu0 %v1306_v16 }
 0x1fe   :  { %1020 = vmatprep.subr.mxu0 %v1183_v0 }
 0x29e   :  { %v282_v27 = vpop.f32.mrf.mxu0 }
 0x29f   :  { %v283_v28 = vadd.f32 %v1354_v18, %v282_v27 }
 0x2a0   :  { %v914_v29 = vpop.f32.mrf.mxu0 }
 0x2a1   :  { %1101 = vtanh.f32 %v283_v28 }
 0x2ae   :  { %v1102_v30 = vpop.eup %1101 }
 0x2af   :  { %288 = vst [vmem:[#allocation8 + $0x10] sm:$0xff] %v1102_v30  ;;  %948 = vmatmul.mubr.f32.vlgmr.msra.gmra.mxu1 %v1102_v30 }
 0x2b0   :  { %986 = vmatpush3.msra.mxu1 %v1221_v1  ;;  %1017 = vmatprep.mubr.msk.f32.mxu1 %vm1184_vm0, %v1183_v0 }
 0x2b1   :  { %987 = vmatprep.subr.mxu1 %v1183_v0 }
 0x2b2   :  { %988 = vmatpush3.msra.mxu1 %v1223_v2 }
 0x2b3   :  { %989 = vmatprep.subr.mxu1 %v1183_v0 }
 0x2b4   :  { %990 = vmatpush3.msra.mxu1 %v1228_v3 }
 0x2b5   :  { %991 = vmatprep.subr.mxu1 %v1183_v0 }
 0x2b6   :  { %992 = vmatpush3.msra.mxu1 %v1234_v4 }
 0x2b7   :  { %993 = vmatprep.subr.mxu1 %v1183_v0 }
 0x2b8   :  { %994 = vmatpush3.msra.mxu1 %v1240_v5 }
 0x2b9   :  { %995 = vmatprep.subr.mxu1 %v1183_v0 }
 0x2ba   :  { %996 = vmatpush3.msra.mxu1 %v1246_v6 }
 0x2bb   :  { %997 = vmatprep.subr.mxu1 %v1183_v0 }
 0x2bc   :  { %998 = vmatpush3.msra.mxu1 %v1252_v7 }
 0x2bd   :  { %999 = vmatprep.subr.mxu1 %v1183_v0 }
 0x2be   :  { %1000 = vmatpush3.msra.mxu1 %v1258_v8 }
 0x2bf   :  { %1001 = vmatprep.subr.mxu1 %v1183_v0 }
 0x2c0   :  { %1002 = vmatpush3.msra.mxu1 %v1264_v9 }
 0x2c1   :  { %1003 = vmatprep.subr.mxu1 %v1183_v0 }
 0x2c2   :  { %1004 = vmatpush3.msra.mxu1 %v1270_v10 }
 0x2c3   :  { %1005 = vmatprep.subr.mxu1 %v1183_v0 }
 0x2c4   :  { %1006 = vmatpush3.msra.mxu1 %v1276_v11 }
 0x2c5   :  { %1007 = vmatprep.subr.mxu1 %v1183_v0 }
 0x2c6   :  { %1008 = vmatpush3.msra.mxu1 %v1282_v12 }
 0x2c7   :  { %1009 = vmatprep.subr.mxu1 %v1183_v0 }
 0x2c8   :  { %1010 = vmatpush3.msra.mxu1 %v1288_v13 }
 0x2c9   :  { %1011 = vmatprep.subr.mxu1 %v1183_v0 }
 0x2ca   :  { %1012 = vmatpush3.msra.mxu1 %v1294_v14 }
 0x2cb   :  { %1013 = vmatprep.subr.mxu1 %v1183_v0 }
 0x2cc   :  { %1014 = vmatpush3.msra.mxu1 %v1300_v15 }
 0x2cd   :  { %1015 = vmatprep.subr.mxu1 %v1183_v0 }
 0x2ce   :  { %1016 = vmatpush3.msra.mxu1 %v1306_v16 }
 0x2cf   :  { %1055 = vmatprep.subr.mxu1 %v1183_v0 }
 0x36f   :  { %v355_v31 = vpop.f32.mrf.mxu1 }
 0x370   :  { %v356_v32 = vadd.f32 %v1354_v18, %v355_v31 }
 0x371   :  { %v949_v33 = vpop.f32.mrf.mxu1 }
 0x372   :  { %1103 = vtanh.f32 %v356_v32 }
 0x37f   :  { %v1104_v34 = vpop.eup %1103 }
 0x380   :  { %361 = vst [vmem:[#allocation8 + $0x18] sm:$0xff] %v1104_v34  ;;  %983 = vmatmul.mubr.f32.vlgmr.msra.gmra.mxu0 %v1104_v34 }
 0x381   :  { %1021 = vmatpush3.msra.mxu0 %v1221_v1  ;;  %1052 = vmatprep.mubr.msk.f32.mxu0 %vm1184_vm0, %v1183_v0 }
 0x382   :  { %1022 = vmatprep.subr.mxu0 %v1183_v0 }
 0x383   :  { %1023 = vmatpush3.msra.mxu0 %v1223_v2 }
 0x384   :  { %1024 = vmatprep.subr.mxu0 %v1183_v0 }
 0x385   :  { %1025 = vmatpush3.msra.mxu0 %v1228_v3 }
 0x386   :  { %1026 = vmatprep.subr.mxu0 %v1183_v0 }
 0x387   :  { %1027 = vmatpush3.msra.mxu0 %v1234_v4 }
 0x388   :  { %1028 = vmatprep.subr.mxu0 %v1183_v0 }
 0x389   :  { %1029 = vmatpush3.msra.mxu0 %v1240_v5 }
 0x38a   :  { %1030 = vmatprep.subr.mxu0 %v1183_v0 }
 0x38b   :  { %1031 = vmatpush3.msra.mxu0 %v1246_v6 }
 0x38c   :  { %1032 = vmatprep.subr.mxu0 %v1183_v0 }
 0x38d   :  { %1033 = vmatpush3.msra.mxu0 %v1252_v7 }
 0x38e   :  { %1034 = vmatprep.subr.mxu0 %v1183_v0 }
 0x38f   :  { %1035 = vmatpush3.msra.mxu0 %v1258_v8 }
 0x390   :  { %1036 = vmatprep.subr.mxu0 %v1183_v0 }
 0x391   :  { %1037 = vmatpush3.msra.mxu0 %v1264_v9 }
 0x392   :  { %1038 = vmatprep.subr.mxu0 %v1183_v0 }
 0x393   :  { %1039 = vmatpush3.msra.mxu0 %v1270_v10 }
 0x394   :  { %1040 = vmatprep.subr.mxu0 %v1183_v0 }
 0x395   :  { %1041 = vmatpush3.msra.mxu0 %v1276_v11 }
 0x396   :  { %1042 = vmatprep.subr.mxu0 %v1183_v0 }
 0x397   :  { %1043 = vmatpush3.msra.mxu0 %v1282_v12 }
 0x398   :  { %1044 = vmatprep.subr.mxu0 %v1183_v0 }
 0x399   :  { %1045 = vmatpush3.msra.mxu0 %v1288_v13 }
 0x39a   :  { %1046 = vmatprep.subr.mxu0 %v1183_v0 }
 0x39b   :  { %1047 = vmatpush3.msra.mxu0 %v1294_v14 }
 0x39c   :  { %1048 = vmatprep.subr.mxu0 %v1183_v0 }
 0x39d   :  { %1049 = vmatpush3.msra.mxu0 %v1300_v15 }
 0x39e   :  { %1050 = vmatprep.subr.mxu0 %v1183_v0 }
 0x39f   :  { %1051 = vmatpush3.msra.mxu0 %v1306_v16 }
 0x440   :  { %v428_v35 = vpop.f32.mrf.mxu0 }
 0x441   :  { %v429_v36 = vadd.f32 %v1354_v18, %v428_v35 }
 0x442   :  { %v984_v37 = vpop.f32.mrf.mxu0 }
 0x443   :  { %1105 = vtanh.f32 %v429_v36 }
 0x450   :  { %v1106_v38 = vpop.eup %1105 }
 0x451   :  { %434 = vst [vmem:[#allocation8 + $0x20] sm:$0xff] %v1106_v38  ;;  %1018 = vmatmul.mubr.f32.vlgmr.msra.gmra.mxu1 %v1106_v38 }
 0x452   :  { %1056 = vmatpush3.msra.mxu1 %v1221_v1  ;;  %1087 = vmatprep.mubr.msk.f32.mxu1 %vm1184_vm0, %v1183_v0 }
 0x453   :  { %1057 = vmatprep.subr.mxu1 %v1183_v0 }
 0x454   :  { %1058 = vmatpush3.msra.mxu1 %v1223_v2 }
 0x455   :  { %1059 = vmatprep.subr.mxu1 %v1183_v0 }
 0x456   :  { %1060 = vmatpush3.msra.mxu1 %v1228_v3 }
 0x457   :  { %1061 = vmatprep.subr.mxu1 %v1183_v0 }
 0x458   :  { %1062 = vmatpush3.msra.mxu1 %v1234_v4 }
 0x459   :  { %1063 = vmatprep.subr.mxu1 %v1183_v0 }
 0x45a   :  { %1064 = vmatpush3.msra.mxu1 %v1240_v5 }
 0x45b   :  { %1065 = vmatprep.subr.mxu1 %v1183_v0 }
 0x45c   :  { %1066 = vmatpush3.msra.mxu1 %v1246_v6 }
 0x45d   :  { %1067 = vmatprep.subr.mxu1 %v1183_v0 }
 0x45e   :  { %1068 = vmatpush3.msra.mxu1 %v1252_v7 }
 0x45f   :  { %1069 = vmatprep.subr.mxu1 %v1183_v0 }
 0x460   :  { %1070 = vmatpush3.msra.mxu1 %v1258_v8 }
 0x461   :  { %1071 = vmatprep.subr.mxu1 %v1183_v0 }
 0x462   :  { %1072 = vmatpush3.msra.mxu1 %v1264_v9 }
 0x463   :  { %1073 = vmatprep.subr.mxu1 %v1183_v0 }
 0x464   :  { %1074 = vmatpush3.msra.mxu1 %v1270_v10 }
 0x465   :  { %1075 = vmatprep.subr.mxu1 %v1183_v0 }
 0x466   :  { %1076 = vmatpush3.msra.mxu1 %v1276_v11 }
 0x467   :  { %1077 = vmatprep.subr.mxu1 %v1183_v0 }
 0x468   :  { %1078 = vmatpush3.msra.mxu1 %v1282_v12 }
 0x469   :  { %1079 = vmatprep.subr.mxu1 %v1183_v0 }
 0x46a   :  { %1080 = vmatpush3.msra.mxu1 %v1288_v13 }
 0x46b   :  { %1081 = vmatprep.subr.mxu1 %v1183_v0 }
 0x46c   :  { %1082 = vmatpush3.msra.mxu1 %v1294_v14 }
 0x46d   :  { %1083 = vmatprep.subr.mxu1 %v1183_v0 }
 0x46e   :  { %1084 = vmatpush3.msra.mxu1 %v1300_v15 }
 0x46f   :  { %1085 = vmatprep.subr.mxu1 %v1183_v0 }
 0x470   :  { %1086 = vmatpush3.msra.mxu1 %v1306_v16 }
 0x511   :  { %v501_v39 = vpop.f32.mrf.mxu1 }
 0x512   :  { %v502_v40 = vadd.f32 %v1354_v18, %v501_v39 }
 0x513   :  { %v1019_v41 = vpop.f32.mrf.mxu1 }
 0x514   :  { %1107 = vtanh.f32 %v502_v40 }
 0x521   :  { %v1108_v42 = vpop.eup %1107 }
 0x522   :  { %507 = vst [vmem:[#allocation8 + $0x28] sm:$0xff] %v1108_v42  ;;  %1053 = vmatmul.mubr.f32.vlgmr.msra.gmra.mxu0 %v1108_v42 }
 0x5e2   :  { %v574_v43 = vpop.f32.mrf.mxu0 }
 0x5e3   :  { %v575_v44 = vadd.f32 %v1354_v18, %v574_v43 }
 0x5e4   :  { %v1054_v45 = vpop.f32.mrf.mxu0 }
 0x5e5   :  { %1109 = vtanh.f32 %v575_v44 }
 0x5f2   :  { %v1110_v46 = vpop.eup %1109 }
 0x5f3   :  { %580 = vst [vmem:[#allocation8 + $0x30] sm:$0xff] %v1110_v46  ;;  %1088 = vmatmul.mubr.f32.vlgmr.msra.gmra.mxu1 %v1110_v46 }
 0x6b3   :  { %v647_v47 = vpop.f32.mrf.mxu1 }
 0x6b4   :  { %v648_v48 = vadd.f32 %v1354_v18, %v647_v47 }
 0x6b5   :  { %v1089_v49 = vpop.f32.mrf.mxu1 }
 0x6b6   :  { %1111 = vtanh.f32 %v648_v48 }
 0x6c3   :  { %v1112_v50 = vpop.eup %1111 }
 0x6c4   :  { %653 = vst [vmem:[#allocation8 + $0x38] sm:$0xff] %v1112_v50 }
 0x6c5   :  { %1164 = shalt.err (!%p1161_p0)
}
 0x6c6   :  { %666 = dma.vmem_to_hbm [thread:$0]  %s661_s24, 1024, %s1541_s3, [#allocation5], %s1181_s20, %s1181_s20, %s1182_s21  }
 0x6c7   :  { %1177 = dma.done.wait [#allocation5], 1024  }
 0x6c8   :  { %1178 = vsyncadd [#allocation5], 4294966272 }
 0x6c9   :  { %670 = vsyncpa [#allocation4], 1 }
 0x6ca   :  { %671 = vsyncpa [#allocation7], 1 }
 0x6cb   :  { %672 = vsyncpa [#allocation5], 1 }

</bundles_post_ra>
